<compile_context>
chip_gen: v7x
topology: tpu7x:2x2x1
jax: 0.10.0
libtpu: 0.0.40
codegen_flags: <defaults>
</compile_context>

<pallas_src>
import jax
import jax.numpy as jnp
from jax import lax
from jax.experimental import pallas as pl
from jax.experimental.pallas import tpu as pltpu


def _round_up(n, m):
    return (n + m - 1) // m * m


def _tcn_kernel(x_ref, w1_ref, b1_ref, w2_ref, b2_ref, wd_ref, bd_ref,
                out_ref, xwin_ref, hwin_ref, *, K, DIL, PAD, HALO, LT):
    """One (batch element, time tile) program.

    x_ref   : (CIN, LT)            compute-dtype input tile
    w1_ref  : (K, COUT, CIN)       per-tap conv1 weights (resident)
    w2_ref  : (K, COUT, COUT)      per-tap conv2 weights (resident)
    wd_ref  : (COUT, CIN) or None  1x1 downsample weight (resident)
    b*_ref  : (COUT, 1)            f32 biases
    out_ref : (COUT, LT)
    xwin_ref: (CIN,  HALO + LT)    persistent x window (left HALO cols = halo)
    hwin_ref: (COUT, HALO + LT)    persistent h1 window
    """
    f32 = jnp.float32
    x_cur = x_ref[...]                                     # (CIN, LT)

    if PAD > 0:
        @pl.when(pl.program_id(1) == 0)
        def _():
            # First time tile of a batch element: causal zero padding.
            xwin_ref[:, :HALO] = jnp.zeros((xwin_ref.shape[0], HALO),
                                           xwin_ref.dtype)
            hwin_ref[:, :HALO] = jnp.zeros((hwin_ref.shape[0], HALO),
                                           hwin_ref.dtype)

        # 128-aligned store of the current tile into the persistent window.
        xwin_ref[:, HALO:] = x_cur

    # ---- conv1: K accumulated tap dots (last tap is the aligned x_cur) ----
    acc1 = jnp.dot(w1_ref[K - 1], x_cur, preferred_element_type=f32)
    for i in range(K - 1):
        off = HALO - PAD + i * DIL
        acc1 = acc1 + jnp.dot(w1_ref[i], xwin_ref[:, off:off + LT],
                              preferred_element_type=f32)
    h1 = jnp.maximum(acc1 + b1_ref[...], 0.0)              # f32 (COUT, LT)
    h1c = h1.astype(x_cur.dtype)

    if PAD > 0:
        hwin_ref[:, HALO:] = h1c

    # ---- conv2: same structure on h1 ---------------------------------------
    acc2 = jnp.dot(w2_ref[K - 1], h1c, preferred_element_type=f32)
    for i in range(K - 1):
        off = HALO - PAD + i * DIL
        acc2 = acc2 + jnp.dot(w2_ref[i], hwin_ref[:, off:off + LT],
                              preferred_element_type=f32)
    h2 = jnp.maximum(acc2 + b2_ref[...], 0.0)

    # ---- residual (identity or 1x1 conv on the same x tile) + final ReLU --
    if wd_ref is None:
        res = x_cur.astype(f32)
    else:
        res = jnp.dot(wd_ref[...], x_cur, preferred_element_type=f32)
        res = res + bd_ref[...]
    out_ref[...] = jnp.maximum(h2 + res, 0.0).astype(out_ref.dtype)

    if PAD > 0:
        # Carry the last PAD columns into the halo slots of the next tile.
        xwin_ref[:, HALO - PAD:HALO] = x_cur[:, LT - PAD:]
        hwin_ref[:, HALO - PAD:HALO] = h1c[:, LT - PAD:]


def tcn_block(x, w1, b1, w2, b2, wd=None, bd=None, *, kernel_size, dilation,
              time_tile=None, compute_dtype=jnp.bfloat16, out_dtype=None):
    """x: (B, C_in, L).  Returns (B, C_out, L) in x.dtype (eval-mode forward)."""
    B, C_in, L = x.shape
    C_out = w1.shape[0]
    K, DIL = kernel_size, dilation
    PAD = (K - 1) * DIL
    has_down = wd is not None
    if not has_down and C_in != C_out:
        raise ValueError("downsample weights are required when C_in != C_out "
                         "(matches PyTorch TCNBlock semantics)")
    if out_dtype is None:
        out_dtype = compute_dtype

    # Channel padding to sublane multiples (16 covers bf16 packing and f32).
    CIN = _round_up(C_in, 16)
    COUT = _round_up(C_out, 16)

    # Time tile: lane-dense multiple of 128; large default to amortize
    # per-grid-step overhead; never smaller than the causal halo.
    if time_tile is None:
        time_tile = min(2048, _round_up(L, 128))
    LT = _round_up(time_tile, 128)
    LT = max(LT, _round_up(max(PAD, 1), 128))
    Lp = _round_up(L, LT)
    T = Lp // LT
    HALO = _round_up(max(PAD, 1), 128)

    # --- parameter packing: per-tap weight matrices (K, COUT, C) -----------
    w1_p = jnp.transpose(w1, (2, 0, 1))                       # (K, Cout, Cin)
    w1_p = jnp.pad(w1_p, ((0, 0), (0, COUT - C_out), (0, CIN - C_in)))
    w1_p = w1_p.astype(compute_dtype)

    w2_p = jnp.transpose(w2, (2, 0, 1))                       # (K, Cout, Cout)
    w2_p = jnp.pad(w2_p, ((0, 0), (0, COUT - C_out), (0, COUT - C_out)))
    w2_p = w2_p.astype(compute_dtype)

    b1_p = jnp.pad(b1, (0, COUT - C_out)).reshape(COUT, 1).astype(jnp.float32)
    b2_p = jnp.pad(b2, (0, COUT - C_out)).reshape(COUT, 1).astype(jnp.float32)

    # Pad channels + right-pad time to a tile multiple; cast MXU operand.
    x_p = jnp.pad(x, ((0, 0), (0, CIN - C_in), (0, Lp - L))).astype(compute_dtype)

    inputs = [x_p, w1_p, b1_p, w2_p, b2_p]
    in_specs = [
        pl.BlockSpec((None, CIN, LT), lambda b, t: (b, 0, t)),    # x tile
        pl.BlockSpec((K, COUT, CIN), lambda b, t: (0, 0, 0)),     # w1 (resident)
        pl.BlockSpec((COUT, 1), lambda b, t: (0, 0)),             # b1
        pl.BlockSpec((K, COUT, COUT), lambda b, t: (0, 0, 0)),    # w2
        pl.BlockSpec((COUT, 1), lambda b, t: (0, 0)),             # b2
    ]

    if has_down:
        wd_p = jnp.pad(wd.reshape(C_out, C_in),
                       ((0, COUT - C_out), (0, CIN - C_in))).astype(compute_dtype)
        bd_p = jnp.pad(bd, (0, COUT - C_out)).reshape(COUT, 1).astype(jnp.float32)
        inputs += [wd_p, bd_p]
        in_specs += [
            pl.BlockSpec((COUT, CIN), lambda b, t: (0, 0)),       # wd
            pl.BlockSpec((COUT, 1), lambda b, t: (0, 0)),         # bd
        ]

        def kernel(x_r, w1_r, b1_r, w2_r, b2_r, wd_r, bd_r, o_r, xw_r, hw_r):
            _tcn_kernel(x_r, w1_r, b1_r, w2_r, b2_r, wd_r, bd_r, o_r, xw_r,
                        hw_r, K=K, DIL=DIL, PAD=PAD, HALO=HALO, LT=LT)
    else:
        def kernel(x_r, w1_r, b1_r, w2_r, b2_r, o_r, xw_r, hw_r):
            _tcn_kernel(x_r, w1_r, b1_r, w2_r, b2_r, None, None, o_r, xw_r,
                        hw_r, K=K, DIL=DIL, PAD=PAD, HALO=HALO, LT=LT)

    out = pl.pallas_call(
        kernel,
        out_shape=jax.ShapeDtypeStruct((B, COUT, Lp), out_dtype),
        grid=(B, T),
        in_specs=in_specs,
        out_specs=pl.BlockSpec((None, COUT, LT), lambda b, t: (b, 0, t)),
        scratch_shapes=[
            pltpu.VMEM((CIN, HALO + LT), compute_dtype),   # x window (halo+tile)
            pltpu.VMEM((COUT, HALO + LT), compute_dtype),  # h1 window
        ],
        compiler_params=pltpu.CompilerParams(
            # Batch axis may shard across TensorCores; the time axis carries
            # the halo window state so it must stay sequential on one core.
            dimension_semantics=("parallel", "arbitrary"),
            vmem_limit_bytes=32 * 1024 * 1024,
        ),
    )(*inputs)

    return out[:, :C_out, :L].astype(x.dtype)


def _reference(x, w1, b1, w2, b2, wd=None, bd=None, *, kernel_size, dilation):
    """Pure-JAX reference reproducing the PyTorch forward (eval mode)."""
    pad = (kernel_size - 1) * dilation
    dn = ('NCH', 'OIH', 'NCH')

    def conv(inp, w, b, dil, p):
        y = lax.conv_general_dilated(inp, w, window_strides=(1,),
                                     padding=[(p, p)], rhs_dilation=(dil,),
                                     dimension_numbers=dn)
        return y + b[None, :, None]

    h = conv(x, w1, b1, dilation, pad)
    if pad:
        h = h[:, :, :-pad]
    h = jnp.maximum(h, 0.0)
    h = conv(h, w2, b2, dilation, pad)
    if pad:
        h = h[:, :, :-pad]
    h = jnp.maximum(h, 0.0)
    res = x if wd is None else conv(x, wd, bd, 1, 0)
    return jnp.maximum(h + res, 0.0)


if __name__ == "__main__":
    key = jax.random.PRNGKey(0)

    def make_params(k, C_in, C_out, K, with_down=True):
        ks = jax.random.split(k, 6)
        w1 = 0.01 * jax.random.normal(ks[0], (C_out, C_in, K), jnp.float32)
        w2 = 0.01 * jax.random.normal(ks[1], (C_out, C_out, K), jnp.float32)
        b1 = jax.random.uniform(ks[3], (C_out,), jnp.float32,
                                -1.0 / (C_in * K) ** 0.5, 1.0 / (C_in * K) ** 0.5)
        b2 = jax.random.uniform(ks[4], (C_out,), jnp.float32,
                                -1.0 / (C_out * K) ** 0.5, 1.0 / (C_out * K) ** 0.5)
        if with_down:
            wd = 0.01 * jax.random.normal(ks[2], (C_out, C_in, 1), jnp.float32)
            bd = jax.random.uniform(ks[5], (C_out,), jnp.float32,
                                    -1.0 / C_in ** 0.5, 1.0 / C_in ** 0.5)
        else:
            wd, bd = None, None
        return w1, b1, w2, b2, wd, bd

    # --- test 1: module demo shapes, f32 compute + f32 output (strict) -----
    B, C_IN, C_OUT, L, K, DIL = 2, 4, 8, 16, 3, 2
    kp, kx, key = jax.random.split(key, 3)
    params = make_params(kp, C_IN, C_OUT, K)
    x = jax.random.normal(kx, (B, C_IN, L), jnp.float32)
    out = tcn_block(x, *params, kernel_size=K, dilation=DIL,
                    compute_dtype=jnp.float32)
    out = jax.block_until_ready(out)
    ref = _reference(x, *params, kernel_size=K, dilation=DIL)
    assert out.shape == (B, C_OUT, L)
    err = float(jnp.max(jnp.abs(out - ref)))
    assert jnp.allclose(out, ref, atol=1e-4, rtol=1e-4), f"f32 max abs err={err}"

    # --- test 2: multi time tile + bf16 MXU path + downsample residual -----
    B, C_IN, C_OUT, L, K, DIL = 2, 8, 16, 300, 3, 4
    kp, kx, key = jax.random.split(key, 3)
    params = make_params(kp, C_IN, C_OUT, K)
    x = jax.random.normal(kx, (B, C_IN, L), jnp.float32)
    out = tcn_block(x, *params, kernel_size=K, dilation=DIL,
                    time_tile=128, compute_dtype=jnp.bfloat16)
    out = jax.block_until_ready(out)
    ref = _reference(x, *params, kernel_size=K, dilation=DIL)
    assert out.shape == (B, C_OUT, L)
    err = float(jnp.max(jnp.abs(out - ref)))
    assert jnp.allclose(out, ref, atol=1e-2, rtol=1e-2), f"bf16 max abs err={err}"

    # --- test 3: C_in == C_out (no downsample, identity residual) ----------
    B, C, L, K, DIL = 1, 16, 200, 3, 2
    kp, kx = jax.random.split(key, 2)
    params = make_params(kp, C, C, K, with_down=False)
    x = jax.random.normal(kx, (B, C, L), jnp.float32)
    out = tcn_block(x, *params, kernel_size=K, dilation=DIL,
                    time_tile=128, compute_dtype=jnp.bfloat16)
    out = jax.block_until_ready(out)
    ref = _reference(x, *params, kernel_size=K, dilation=DIL)
    assert out.shape == (B, C, L)
    err = float(jnp.max(jnp.abs(out - ref)))
    assert jnp.allclose(out, ref, atol=1e-2, rtol=1e-2), f"identity-res err={err}"

    print("KERNEL_OK")
</pallas_src>

<mosaic_0001>
module attributes {stable_mosaic.version = 11 : i64} {
  func.func @kernel(%arg0: i32, %arg1: i32, %arg2: memref<1x16x128xf32, #tpu.memory_space<vmem>>, %arg3: memref<3x16x16xf32, #tpu.memory_space<vmem>>, %arg4: memref<16x1xf32, #tpu.memory_space<vmem>>, %arg5: memref<3x16x16xf32, #tpu.memory_space<vmem>>, %arg6: memref<16x1xf32, #tpu.memory_space<vmem>>, %arg7: memref<16x16xf32, #tpu.memory_space<vmem>>, %arg8: memref<16x1xf32, #tpu.memory_space<vmem>>, %arg9: memref<1x16x128xf32, #tpu.memory_space<vmem>>, %arg10: memref<16x256xf32, #tpu.memory_space<vmem>>, %arg11: memref<16x256xf32, #tpu.memory_space<vmem>>) attributes {dimension_semantics = [#tpu.dimension_semantics<parallel>, #tpu.dimension_semantics<arbitrary>], iteration_bounds = array<i64: 2, 1>, scalar_prefetch = 0 : i64, scratch_operands = 2 : i64, tpu.core_type = #tpu.core_type<tc>, window_params = [{transform_indices = @transform_0, window_bounds = array<i64: 1, 16, 128>}, {pipeline_mode = #tpu.pipeline_mode<synchronous>, transform_indices = @transform_1, window_bounds = array<i64: 3, 16, 16>}, {pipeline_mode = #tpu.pipeline_mode<synchronous>, transform_indices = @transform_2, window_bounds = array<i64: 16, 1>}, {pipeline_mode = #tpu.pipeline_mode<synchronous>, transform_indices = @transform_3, window_bounds = array<i64: 3, 16, 16>}, {pipeline_mode = #tpu.pipeline_mode<synchronous>, transform_indices = @transform_4, window_bounds = array<i64: 16, 1>}, {pipeline_mode = #tpu.pipeline_mode<synchronous>, transform_indices = @transform_5, window_bounds = array<i64: 16, 16>}, {pipeline_mode = #tpu.pipeline_mode<synchronous>, transform_indices = @transform_6, window_bounds = array<i64: 16, 1>}, {transform_indices = @transform_7, window_bounds = array<i64: 1, 16, 128>}]} {
    %c0 = arith.constant 0 : index
    %c0_0 = arith.constant 0 : index
    %c0_1 = arith.constant 0 : index
    %0 = vector.load %arg2[%c0, %c0_0, %c0_1] : memref<1x16x128xf32, #tpu.memory_space<vmem>>, vector<1x16x128xf32>
    %1 = vector.shape_cast %0 : vector<1x16x128xf32> to vector<16x128xf32>
    %c0_i32 = arith.constant 0 : i32
    %2 = arith.cmpi eq, %arg1, %c0_i32 : i32
    %3 = arith.extui %2 : i1 to i32
    %c0_i32_2 = arith.constant 0 : i32
    %4 = arith.cmpi ne, %3, %c0_i32_2 : i32
    scf.if %4 {
      %cst_52 = arith.constant 0.000000e+00 : f32
      %58 = vector.broadcast %cst_52 : f32 to vector<16x128xf32>
      %c0_53 = arith.constant 0 : index
      %c0_54 = arith.constant 0 : index
      %59 = vector.load %arg10[%c0_53, %c0_54] : memref<16x256xf32, #tpu.memory_space<vmem>>, vector<16x128xf32>
      tpu.vector_store %arg10[%c0_53, %c0_54], %58 {strides = array<i32>} : memref<16x256xf32, #tpu.memory_space<vmem>>, vector<16x128xf32>,
      %cst_55 = arith.constant 0.000000e+00 : f32
      %60 = vector.broadcast %cst_55 : f32 to vector<16x128xf32>
      %c0_56 = arith.constant 0 : index
      %c0_57 = arith.constant 0 : index
      %61 = vector.load %arg11[%c0_56, %c0_57] : memref<16x256xf32, #tpu.memory_space<vmem>>, vector<16x128xf32>
      tpu.vector_store %arg11[%c0_56, %c0_57], %60 {strides = array<i32>} : memref<16x256xf32, #tpu.memory_space<vmem>>, vector<16x128xf32>,
    } else {
    }
    %c0_3 = arith.constant 0 : index
    %c128 = arith.constant 128 : index
    %5 = vector.load %arg10[%c0_3, %c128] : memref<16x256xf32, #tpu.memory_space<vmem>>, vector<16x128xf32>
    tpu.vector_store %arg10[%c0_3, %c128], %1 {strides = array<i32>} : memref<16x256xf32, #tpu.memory_space<vmem>>, vector<16x128xf32>,
    %c2 = arith.constant 2 : index
    %c0_4 = arith.constant 0 : index
    %c0_5 = arith.constant 0 : index
    %6 = vector.load %arg3[%c2, %c0_4, %c0_5] : memref<3x16x16xf32, #tpu.memory_space<vmem>>, vector<1x16x16xf32>
    %7 = vector.shape_cast %6 : vector<1x16x16xf32> to vector<16x16xf32>
    %cst = arith.constant dense<0.000000e+00> : vector<16x128xf32>
    %8 = tpu.matmul %7, %1, %cst {dimension_numbers = #tpu.dot_dimension_numbers<[1], [0], [0], [1], [0, 0, 1, 1], [], []>} : vector<16x16xf32>, vector<16x128xf32>, vector<16x128xf32> -> vector<16x128xf32>
    %c0_6 = arith.constant 0 : index
    %c0_7 = arith.constant 0 : index
    %c0_8 = arith.constant 0 : index
    %9 = vector.load %arg3[%c0_6, %c0_7, %c0_8] : memref<3x16x16xf32, #tpu.memory_space<vmem>>, vector<1x16x16xf32>
    %10 = vector.shape_cast %9 : vector<1x16x16xf32> to vector<16x16xf32>
    %c0_9 = arith.constant 0 : index
    %c124 = arith.constant 124 : index
    %11 = vector.load %arg10[%c0_9, %c124] : memref<16x256xf32, #tpu.memory_space<vmem>>, vector<16x128xf32>
    %cst_10 = arith.constant dense<0.000000e+00> : vector<16x128xf32>
    %12 = tpu.matmul %10, %11, %cst_10 {dimension_numbers = #tpu.dot_dimension_numbers<[1], [0], [0], [1], [0, 0, 1, 1], [], []>} : vector<16x16xf32>, vector<16x128xf32>, vector<16x128xf32> -> vector<16x128xf32>
    %13 = arith.addf %8, %12 : vector<16x128xf32>
    %c1 = arith.constant 1 : index
    %c0_11 = arith.constant 0 : index
    %c0_12 = arith.constant 0 : index
    %14 = vector.load %arg3[%c1, %c0_11, %c0_12] : memref<3x16x16xf32, #tpu.memory_space<vmem>>, vector<1x16x16xf32>
    %15 = vector.shape_cast %14 : vector<1x16x16xf32> to vector<16x16xf32>
    %c0_13 = arith.constant 0 : index
    %c126 = arith.constant 126 : index
    %16 = vector.load %arg10[%c0_13, %c126] : memref<16x256xf32, #tpu.memory_space<vmem>>, vector<16x128xf32>
    %cst_14 = arith.constant dense<0.000000e+00> : vector<16x128xf32>
    %17 = tpu.matmul %15, %16, %cst_14 {dimension_numbers = #tpu.dot_dimension_numbers<[1], [0], [0], [1], [0, 0, 1, 1], [], []>} : vector<16x16xf32>, vector<16x128xf32>, vector<16x128xf32> -> vector<16x128xf32>
    %18 = arith.addf %13, %17 : vector<16x128xf32>
    %c0_15 = arith.constant 0 : index
    %c0_16 = arith.constant 0 : index
    %19 = vector.load %arg4[%c0_15, %c0_16] : memref<16x1xf32, #tpu.memory_space<vmem>>, vector<16x1xf32>
    %20 = vector.broadcast %19 : vector<16x1xf32> to vector<16x128xf32>
    %21 = arith.addf %18, %20 : vector<16x128xf32>
    %cst_17 = arith.constant 0.000000e+00 : f32
    %22 = vector.broadcast %cst_17 : f32 to vector<16x128xf32>
    %23 = arith.maximumf %21, %22 : vector<16x128xf32>
    %c0_18 = arith.constant 0 : index
    %c128_19 = arith.constant 128 : index
    %24 = vector.load %arg11[%c0_18, %c128_19] : memref<16x256xf32, #tpu.memory_space<vmem>>, vector<16x128xf32>
    tpu.vector_store %arg11[%c0_18, %c128_19], %23 {strides = array<i32>} : memref<16x256xf32, #tpu.memory_space<vmem>>, vector<16x128xf32>,
    %c2_20 = arith.constant 2 : index
    %c0_21 = arith.constant 0 : index
    %c0_22 = arith.constant 0 : index
    %25 = vector.load %arg5[%c2_20, %c0_21, %c0_22] : memref<3x16x16xf32, #tpu.memory_space<vmem>>, vector<1x16x16xf32>
    %26 = vector.shape_cast %25 : vector<1x16x16xf32> to vector<16x16xf32>
    %cst_23 = arith.constant dense<0.000000e+00> : vector<16x128xf32>
    %27 = tpu.matmul %26, %23, %cst_23 {dimension_numbers = #tpu.dot_dimension_numbers<[1], [0], [0], [1], [0, 0, 1, 1], [], []>} : vector<16x16xf32>, vector<16x128xf32>, vector<16x128xf32> -> vector<16x128xf32>
    %c0_24 = arith.constant 0 : index
    %c0_25 = arith.constant 0 : index
    %c0_26 = arith.constant 0 : index
    %28 = vector.load %arg5[%c0_24, %c0_25, %c0_26] : memref<3x16x16xf32, #tpu.memory_space<vmem>>, vector<1x16x16xf32>
    %29 = vector.shape_cast %28 : vector<1x16x16xf32> to vector<16x16xf32>
    %c0_27 = arith.constant 0 : index
    %c124_28 = arith.constant 124 : index
    %30 = vector.load %arg11[%c0_27, %c124_28] : memref<16x256xf32, #tpu.memory_space<vmem>>, vector<16x128xf32>
    %cst_29 = arith.constant dense<0.000000e+00> : vector<16x128xf32>
    %31 = tpu.matmul %29, %30, %cst_29 {dimension_numbers = #tpu.dot_dimension_numbers<[1], [0], [0], [1], [0, 0, 1, 1], [], []>} : vector<16x16xf32>, vector<16x128xf32>, vector<16x128xf32> -> vector<16x128xf32>
    %32 = arith.addf %27, %31 : vector<16x128xf32>
    %c1_30 = arith.constant 1 : index
    %c0_31 = arith.constant 0 : index
    %c0_32 = arith.constant 0 : index
    %33 = vector.load %arg5[%c1_30, %c0_31, %c0_32] : memref<3x16x16xf32, #tpu.memory_space<vmem>>, vector<1x16x16xf32>
    %34 = vector.shape_cast %33 : vector<1x16x16xf32> to vector<16x16xf32>
    %c0_33 = arith.constant 0 : index
    %c126_34 = arith.constant 126 : index
    %35 = vector.load %arg11[%c0_33, %c126_34] : memref<16x256xf32, #tpu.memory_space<vmem>>, vector<16x128xf32>
    %cst_35 = arith.constant dense<0.000000e+00> : vector<16x128xf32>
    %36 = tpu.matmul %34, %35, %cst_35 {dimension_numbers = #tpu.dot_dimension_numbers<[1], [0], [0], [1], [0, 0, 1, 1], [], []>} : vector<16x16xf32>, vector<16x128xf32>, vector<16x128xf32> -> vector<16x128xf32>
    %37 = arith.addf %32, %36 : vector<16x128xf32>
    %c0_36 = arith.constant 0 : index
    %c0_37 = arith.constant 0 : index
    %38 = vector.load %arg6[%c0_36, %c0_37] : memref<16x1xf32, #tpu.memory_space<vmem>>, vector<16x1xf32>
    %39 = vector.broadcast %38 : vector<16x1xf32> to vector<16x128xf32>
    %40 = arith.addf %37, %39 : vector<16x128xf32>
    %cst_38 = arith.constant 0.000000e+00 : f32
    %41 = vector.broadcast %cst_38 : f32 to vector<16x128xf32>
    %42 = arith.maximumf %40, %41 : vector<16x128xf32>
    %c0_39 = arith.constant 0 : index
    %c0_40 = arith.constant 0 : index
    %43 = vector.load %arg7[%c0_39, %c0_40] : memref<16x16xf32, #tpu.memory_space<vmem>>, vector<16x16xf32>
    %cst_41 = arith.constant dense<0.000000e+00> : vector<16x128xf32>
    %44 = tpu.matmul %43, %1, %cst_41 {dimension_numbers = #tpu.dot_dimension_numbers<[1], [0], [0], [1], [0, 0, 1, 1], [], []>} : vector<16x16xf32>, vector<16x128xf32>, vector<16x128xf32> -> vector<16x128xf32>
    %c0_42 = arith.constant 0 : index
    %c0_43 = arith.constant 0 : index
    %45 = vector.load %arg8[%c0_42, %c0_43] : memref<16x1xf32, #tpu.memory_space<vmem>>, vector<16x1xf32>
    %46 = vector.broadcast %45 : vector<16x1xf32> to vector<16x128xf32>
    %47 = arith.addf %44, %46 : vector<16x128xf32>
    %48 = arith.addf %42, %47 : vector<16x128xf32>
    %cst_44 = arith.constant 0.000000e+00 : f32
    %49 = vector.broadcast %cst_44 : f32 to vector<16x128xf32>
    %50 = arith.maximumf %48, %49 : vector<16x128xf32>
    %c0_45 = arith.constant 0 : index
    %c0_46 = arith.constant 0 : index
    %c0_47 = arith.constant 0 : index
    %51 = vector.load %arg9[%c0_45, %c0_46, %c0_47] : memref<1x16x128xf32, #tpu.memory_space<vmem>>, vector<1x16x128xf32>
    %52 = vector.shape_cast %51 : vector<1x16x128xf32> to vector<16x128xf32>
    %53 = vector.shape_cast %50 : vector<16x128xf32> to vector<1x16x128xf32>
    tpu.vector_store %arg9[%c0_45, %c0_46, %c0_47], %53 {strides = array<i32>} : memref<1x16x128xf32, #tpu.memory_space<vmem>>, vector<1x16x128xf32>,
    %54 = vector.extract_strided_slice %1 {offsets = [0, 124], sizes = [16, 4], strides = [1, 1]} : vector<16x128xf32> to vector<16x4xf32>
    %c0_48 = arith.constant 0 : index
    %c124_49 = arith.constant 124 : index
    %55 = vector.load %arg10[%c0_48, %c124_49] : memref<16x256xf32, #tpu.memory_space<vmem>>, vector<16x4xf32>
    tpu.vector_store %arg10[%c0_48, %c124_49], %54 {strides = array<i32>} : memref<16x256xf32, #tpu.memory_space<vmem>>, vector<16x4xf32>,
    %56 = vector.extract_strided_slice %23 {offsets = [0, 124], sizes = [16, 4], strides = [1, 1]} : vector<16x128xf32> to vector<16x4xf32>
    %c0_50 = arith.constant 0 : index
    %c124_51 = arith.constant 124 : index
    %57 = vector.load %arg11[%c0_50, %c124_51] : memref<16x256xf32, #tpu.memory_space<vmem>>, vector<16x4xf32>
    tpu.vector_store %arg11[%c0_50, %c124_51], %56 {strides = array<i32>} : memref<16x256xf32, #tpu.memory_space<vmem>>, vector<16x4xf32>,
    return
  }
  func.func @transform_0(%arg0: i32, %arg1: i32) -> (i32, i32, i32) {
    %c0_i32 = arith.constant 0 : i32
    %c0_i32_0 = arith.constant 0 : i32
    return %arg0, %c0_i32, %arg1 : i32, i32, i32
  }
  func.func @transform_1(%arg0: i32, %arg1: i32) -> (i32, i32, i32) {
    %c0_i32 = arith.constant 0 : i32
    %c0_i32_0 = arith.constant 0 : i32
    %c0_i32_1 = arith.constant 0 : i32
    %c0_i32_2 = arith.constant 0 : i32
    return %c0_i32, %c0_i32_0, %c0_i32_1 : i32, i32, i32
  }
  func.func @transform_2(%arg0: i32, %arg1: i32) -> (i32, i32) {
    %c0_i32 = arith.constant 0 : i32
    %c0_i32_0 = arith.constant 0 : i32
    %c0_i32_1 = arith.constant 0 : i32
    return %c0_i32, %c0_i32_0 : i32, i32
  }
  func.func @transform_3(%arg0: i32, %arg1: i32) -> (i32, i32, i32) {
    %c0_i32 = arith.constant 0 : i32
    %c0_i32_0 = arith.constant 0 : i32
    %c0_i32_1 = arith.constant 0 : i32
    %c0_i32_2 = arith.constant 0 : i32
    return %c0_i32, %c0_i32_0, %c0_i32_1 : i32, i32, i32
  }
  func.func @transform_4(%arg0: i32, %arg1: i32) -> (i32, i32) {
    %c0_i32 = arith.constant 0 : i32
    %c0_i32_0 = arith.constant 0 : i32
    %c0_i32_1 = arith.constant 0 : i32
    return %c0_i32, %c0_i32_0 : i32, i32
  }
  func.func @transform_5(%arg0: i32, %arg1: i32) -> (i32, i32) {
    %c0_i32 = arith.constant 0 : i32
    %c0_i32_0 = arith.constant 0 : i32
    %c0_i32_1 = arith.constant 0 : i32
    return %c0_i32, %c0_i32_0 : i32, i32
  }
  func.func @transform_6(%arg0: i32, %arg1: i32) -> (i32, i32) {
    %c0_i32 = arith.constant 0 : i32
    %c0_i32_0 = arith.constant 0 : i32
    %c0_i32_1 = arith.constant 0 : i32
    return %c0_i32, %c0_i32_0 : i32, i32
  }
  func.func @transform_7(%arg0: i32, %arg1: i32) -> (i32, i32, i32) {
    %c0_i32 = arith.constant 0 : i32
    %c0_i32_0 = arith.constant 0 : i32
    return %arg0, %c0_i32, %arg1 : i32, i32, i32
  }
}

</mosaic_0001>

<bundles_post_ra>
// kernel: tpu_custom_call.1
= control target key start
LH: loop header
LB: loop body
LE: loop exit
PB: predicated region body
PF: predicated region fallthrough
CT: control target
= control target key end

     0   :  { %s1939_s0 = inlined_call_operand.hbm [shape: f32[2,16,128], index: 0, kind: input, shape index: {}]   ;;  %s1940_s1 = inlined_call_operand.vmem [shape: f32[3,16,16], index: 1, kind: input, shape index: {}]   ;;  %s1941_s2 = inlined_call_operand.vmem [shape: f32[16,1], index: 2, kind: input, shape index: {}]   ;;  %s1942_s3 = inlined_call_operand.hbm [shape: f32[3,16,16], index: 3, kind: input, shape index: {}]   ;;  %s1943_s4 = inlined_call_operand.vmem [shape: f32[16,1], index: 4, kind: input, shape index: {}]   ;;  %s1944_s5 = inlined_call_operand.vmem [shape: f32[16,16], index: 5, kind: input, shape index: {}]   ;;  %s1945_s6 = inlined_call_operand.vmem [shape: f32[16,1], index: 6, kind: input, shape index: {}]   ;;  %s1946_s7 = inlined_call_operand.hbm [shape: f32[2,16,128], index: 7, kind: output, shape index: {}]  }
   0x1   :  { %1953 = sst [smem:[#allocation13_spill]] %s1942_s3 }
   0x2   :  { %12 = vsyncpa [#allocation5], 0 }
   0x3   :  { %14 = vsyncpa [#allocation5 + $0x1], 0 }
   0x4   :  { %15 = vsyncpa [#allocation8], 0 }
   0x5   :  { %16 = vsyncpa [#allocation6], 0 }
   0x6   :  { %18 = vsyncpa [#allocation6 + $0x1], 0  ;;  %s1634_s24 = smov 0   ;;  %s1636_s25 = smov 0  }
   0x7   :  { %s1638_s26 = smov 0   ;;  %s1640_s27 = smov 0  }
   0x8   :  { %s1642_s28 = smov 0   ;;  %s1644_s29 = smov 0  }
   0x9 LB: > { %s1164_s30 = sadd.s32 4294967295, %s1581_s29   ;;  %s1165_s8 = sadd.s32 4294967294, %s1581_s29   ;;  %s1581_s29 = sphi %s1644_s29, %s24_s29   ;;  %s1577_s28 = sphi %s1642_s28, %s1976_s28   ;;  %s1573_s27 = sphi %s1640_s27, %s1975_s27   ;;  %s1569_s26 = sphi %s1638_s26, %s1974_s26   ;;  %s1565_s25 = sphi %s1636_s25, %s1973_s25   ;;  %s1561_s24 = sphi %s1634_s24, %s1972_s24  }
   0xa   : > { %p58_p0 = scmp.ne.s32.totalorder %s1565_s25, %s1561_s24  ;;  %p1668_p1 = scmp.eq.s32.totalorder %s1164_s30, 0 }
   0xb   : > { %p1672_p2 = scmp.eq.s32.totalorder %s1164_s30, 1  ;;  %p216_p3 = scmp.eq.s32.totalorder %s1165_s8, 1 }
   0xc   : > { %s1954_s9 = scalar_select %p1668_p1, 1, 0 }
   0xd   : > { %s1955_s10 = scalar_select %p1672_p2, 1, 0 }
   0xe   : > { %p1678_p4 = por %p1668_p1, %p58_p0  ;;  %p1166_p5 = scmp.ge.s32.totalorder %s1581_s29, 1 }
   0xf   : > { %p1683_p6 = por %p216_p3, %p58_p0  ;;  %p223_p7 = scmp.lt.s32.totalorder %s1581_s29, 3 }
  0x10   : > { %s1956_s11 = scalar_select %p1678_p4, 1, 0 }
  0x11   : > { %s1957_s12 = scalar_select %p1683_p6, 1, 0 }
  0x12   : > { %p1688_p8 = pnand %p1166_p5, %p223_p7  ;;  %s1583_s14 = smov [#allocation7]  }
  0x13   : > { %s241_s15 = sshll.u32 %s1583_s14, 4  ;;  %s36_s17 = sadd.s32 1, %s1577_s28  ;;  %s242_s15 = int_to_ptr.vmem [resolvable:$true] %s241_s15 }
  0x14   : > { %s1958_s13 = scalar_select %p1688_p8, 1, 0 }
  0x15   : > { %p1322_p9 = pneg %p1688_p8  ;;  %s1960_s3 = sld [smem:[#allocation13_spill]] }
  0x17   : > { %p1697_p11 = pnand %p1322_p9, %p1668_p1 }
  0x19   : > { %p1439_p13 = pneg %p1697_p11 }
  0x1b   : > { %s1437_s20 = scalar_lea.hbm %s1960_s3, 768 }
  0x1c   : > { %p1438_p12 = scmp.ne.s32.totalorder %s1960_s3, %s1437_s20  ;;  %p1444_p5 = scmp.lt.u32.totalorder %s1437_s20, %s1960_s3 }
  0x1e   : > { %p1440_p0 = pnand %p1439_p13, %p1438_p12 }
  0x20   : > { %p1441_p3 = pneg %p1440_p0 }
  0x22   : > { %p1446_p7 = pnand %p1444_p5, %p1441_p3 }
  0x24   : > { %1449 = shalt.err (!%p1446_p7)
}
  0x25   : > { %s1450_s8 = scalar_lea.vmem %s242_s15, 768  ;;  %p1458_p1 = scmp.lt.s32.totalorder %s242_s15, %s242_s15 }
  0x26   : > { %p1451_p9 = scmp.ne.s32.totalorder %s242_s15, %s1450_s8  ;;  %p1459_p4 = scmp.lt.s32.totalorder %s1450_s8, %s1450_s8 }
  0x28   : > { %p1453_p10 = pnand %p1451_p9, %p1439_p13  ;;  %p1460_p8 = por %p1459_p4, %p1458_p1 }
  0x2a   : > { %p1454_p6 = pneg %p1453_p10 }
  0x2c   : > { %p1461_p2 = pnand %p1460_p8, %p1454_p6 }
  0x2e   : > { %1464 = shalt.err (!%p1461_p2)
}
  0x2f   : > { %s1951_s14 = smov 128   ;;  %s1952_s18 = smov 8  }
  0x30   : > { %1325 = dma.hbm_to_vmem [thread:$0]  (!%p1697_p11), %s1960_s3, 768, %s242_s15, [#allocation8], %s1951_s14, %s1951_s14, %s1952_s18  }
  0x31   : > { %p38_p1 = scmp.ge.s32.totalorder %s36_s17, 2  ;;  %s45_s21 = sadd.s32 1, %s1569_s26 }
  0x32   : > { %p52_p2 = scmp.ne.s32.totalorder %s1569_s26, %s1565_s25  ;;  %p53_p4 = scmp.eq.s32.totalorder %s1581_s29, 0 }
  0x33   : > { %s1978_s17 = smov (%p38_p1, %s36_s17), 0  ;;  %p1962_p8 = scmp.ne.s32.totalorder %s1955_s10, 0 }
  0x34   : > { %p1727_p6 = por %p53_p4, %p52_p2  ;;  %s40_s23 = ssub.s32 %s1577_s28, %s1978_s17 }
  0x35   : > { %p1733_p10 = por %p1962_p8, %p52_p2  ;;  %p1335_p12 = scmp.lt.s32.totalorder %s1581_s29, 2 }
  0x36   : > { %p43_p11 = scmp.eq.s32.totalorder %s40_s23, 0  ;;  %s264_s15 = sand.u32 1, %s1569_s26  }
  0x37   : > { %s1169_s30 = sshll.u32 %s264_s15, 4  ;;  %s1199_s19 = sshll.u32 %s1577_s28, 8 }
  0x38   : > { %s1742_s8 = scalar_select %p43_p11, %s1569_s26, %s45_s21  }
  0x39   : > { %s1748_s18 = scalar_lea.hbm %s1939_s0, %s1199_s19  ;;  %s268_s10 = scalar_lea.vmem [#allocation4], %s1169_s30 }
  0x3a   : > { %s276_s3 = sshll.u32 %s268_s10, 4  ;;  %p1754_p13 = pnand %p1335_p12, %p1727_p6  ;;  %s1750_s3 = int_to_ptr.vmem [resolvable:$true] %s276_s3 }
  0x3b   : > { %s1758_s21 = scalar_lea.sflag [#allocation5], %s264_s15  ;;  %s1465_s14 = scalar_lea.hbm %s1748_s18, 256 }
  0x3c   : > { %p1466_p0 = scmp.ne.s32.totalorder %s1748_s18, %s1465_s14  ;;  %p1467_p3 = pneg %p1754_p13 }
  0x3d   : > { %s1470_s22 = scalar_lea.hbm %s1939_s0, 512  ;;  %p1471_p9 = scmp.lt.u32.totalorder %s1748_s18, %s1939_s0 }
  0x3e   : > { %p1468_p5 = pnand %p1467_p3, %p1466_p0  ;;  %p1472_p1 = scmp.lt.u32.totalorder %s1470_s22, %s1465_s14 }
  0x3f   : > { %p1474_p4 = scmp.lt.u32.totalorder %s1465_s14, %s1748_s18 }
  0x40   : > { %p1469_p7 = pneg %p1468_p5  ;;  %p1473_p2 = por %p1472_p1, %p1471_p9 }
  0x42   : > { %p1475_p6 = por %p1474_p4, %p1473_p2 }
  0x44   : > { %p1476_p8 = pnand %p1475_p6, %p1469_p7 }
  0x46   : > { %1479 = shalt.err (!%p1476_p8)
}
  0x47   : > { %s1480_s15 = scalar_lea.vmem %s1750_s3, 256  ;;  %s1586_s30 = smov [#allocation4]  }
  0x48   : > { %p1481_p12 = scmp.ne.s32.totalorder %s1750_s3, %s1480_s15  ;;  %s1485_s19 = sshll.u32 %s1586_s30, 4  ;;  %s1486_s19 = int_to_ptr.vmem [resolvable:$false] %s1485_s19 }
  0x49   : > { %s1487_s20 = scalar_lea.vmem %s1486_s19, 512  ;;  %p1488_p5 = scmp.lt.s32.totalorder %s1750_s3, %s1486_s19 }
  0x4a   : > { %p1483_p11 = pnand %p1481_p12, %p1467_p3  ;;  %p1489_p9 = scmp.lt.s32.totalorder %s1487_s20, %s1480_s15 }
  0x4c   : > { %p1484_p0 = pneg %p1483_p11  ;;  %p1490_p1 = por %p1489_p9, %p1488_p5 }
  0x4e   : > { %p1491_p2 = pnand %p1490_p1, %p1484_p0 }
  0x50   : > { %1494 = shalt.err (!%p1491_p2)
}
  0x51   : > { %s1965_s14 = smov 8   ;;  %s1966_s22 = smov 128  }
  0x52   : > { %1329 = dma.hbm_to_vmem [thread:$0]  (!%p1754_p13), %s1748_s18, 256, %s1750_s3, %s1758_s21, %s1966_s22, %s1966_s22, %s1965_s14  }
  0x53   : > { %p1967_p3 = scmp.ne.s32.totalorder %s1958_s13, 0 }
  0x54   : > { %s1792_s10 = sand.u32 (!%p1967_p3), 1, %s1565_s25   ;;  %p1968_p7 = scmp.ne.s32.totalorder (!%p1967_p3), %s1956_s11, 0 }
  0x55   : > { %288 = sbr.rel (%p1967_p3) target bundleno = 838 (0x346), region = 48  ;;  %s1173_s15 = sshll.u32 (!%p1967_p3), %s1792_s10, 4 }
  0x56   : > { %s291_s30 = scalar_lea.sflag (!%p1967_p3), [#allocation5], %s1792_s10  ;;  %s294_s23 = scalar_lea.vmem (!%p1967_p3), [#allocation4], %s1173_s15 }
  0x5c   : > { %1548 = dma.done.wait (%p1968_p7), %s291_s30, 256  }
  0x5d   : > { %1550 = vsyncadd (%p1968_p7), %s291_s30, 4294967040  ;;  %p1969_p13 = scmp.ne.s32.totalorder %s1954_s9, 0 }
  0x5f   : > { %1552 = dma.done.wait (%p1969_p13), [#allocation8], 768  }
  0x60   : > { %1554 = vsyncadd (%p1969_p13), [#allocation8], 4294966528  ;;  %v329_v0 = vld [vmem:[%s294_s23] sm:$0xff]  ;;  %v330_v1 = vld [vmem:[%s294_s23 + $0x8] sm:$0xff]  ;;  %vm367_vm0 = vcmask 130048   ;;  %v1587_v3 = vmov 0.0  }
  0x61   : > { %v344_v2 = vld [vmem:[%s1940_s1] sm:$0xff]  ;;  %v1395_v4 = vpack.i.bf16 %v329_v0, %v1587_v3  ;;  %s1588_s11 = smov 4   ;;  %v1400_v5 = vpack.i.bf16 %v330_v1, %v1587_v3  ;;  %s1589_s18 = smov 2   ;;  %v1282_v6 = vpack.c.bf16 %v330_v1, %v329_v0  ;;  %v630_v7 = vld [vmem:[%s1941_s2 + $0x8] sm:$0xff]  ;;  %v1590_v9 = vmov 0   ;;  %v1182_v31 = vld [vmem:[%s1940_s1 + $0x10] sm:$0xff] }
  0x62   : > { %1233 = vmatprep.mubr.msk.f32.mxu0 %vm367_vm0, %v344_v2  ;;  %v629_v8 = vld [vmem:[%s1941_s2] sm:$0xff]  ;;  %1416 = vset.pattern.permute.xlu1 %v1590_v9  ;;  %vm362_vm1 = vcmask 31744   ;;  %vm541_vm2 = vcmask 15360   ;;  %v345_v27 = vld [vmem:[%s1940_s1 + $0x8] sm:$0xff]  ;;  %v1183_v32 = vld [vmem:[%s1940_s1 + $0x18] sm:$0xff]  ;;  %s1200_s30 = sshll.u32 %s1573_s27, 8 }
  0x63   : > { %1396 = vrot.lane.b32.xlu0 %v1395_v4, %s1588_s11  ;;  %1406 = vrot.lane.b32.xlu1 %v1395_v4, %s1589_s18  ;;  %v1176_v29 = vld [vmem:[%s1940_s1 + $0x20] sm:$0xff]  ;;  %v1177_v30 = vld [vmem:[%s1940_s1 + $0x28] sm:$0xff]  ;;  %s1890_s13 = scalar_lea.hbm %s1946_s7, %s1200_s30  ;;  %s1591_s27 = smov [#allocation9]  }
  0x64   : > { %1415 = vset.pattern.permute.xlu0 %v1590_v9  ;;  %v948_v33 = vld [vmem:[%s1944_s5] sm:$0xff]  ;;  %v949_v34 = vld [vmem:[%s1944_s5 + $0x8] sm:$0xff]  ;;  %s1499_s21 = sshll.u32 %s1591_s27, 4  ;;  %s1500_s21 = int_to_ptr.vmem [resolvable:$false] %s1499_s21 }
  0x65   : > { %v650_v41 = vld [vmem:[#allocation7] sm:$0xff]  ;;  %v933_v47 = vld [vmem:[%s1943_s4 + $0x8] sm:$0xff]  ;;  %s1501_s19 = scalar_lea.vmem %s1500_s21, 512 }
  0x66   : > { %1254 = vmatprep.mubr.msk.f32.mxu1 %vm367_vm0, %v650_v41  ;;  %v932_v48 = vld [vmem:[%s1943_s4] sm:$0xff]  ;;  %v951_v49 = vld [vmem:[%s1945_s6 + $0x8] sm:$0xff] }
  0x67   : > { %1401 = vrot.lane.b32.xlu0 %v1400_v5, %s1588_s11  ;;  %1411 = vrot.lane.b32.xlu1 %v1400_v5, %s1589_s18  ;;  %v950_v50 = vld [vmem:[%s1945_s6] sm:$0xff]  ;;  %v651_v4 = vld [vmem:[#allocation7 + $0x8] sm:$0xff] }
  0x68   : > { %v649_v9 = vld [vmem:[#allocation7 + $0x28] sm:$0xff] }
  0x6b   : > { %638 = vperm.xlu1 %1416, %v630_v7   ;;  %633 = vperm.xlu0 %1415, %v629_v8   ;;  %v648_v7 = vld [vmem:[#allocation7 + $0x20] sm:$0xff] }
  0xd5   : > { %v1397_v10 = vpop.permute.xlu0 %1396  ;;  %v1407_v11 = vpop.permute.xlu1 %1406 }
  0xd6   : > { %v1399_v12 = vunpack.i.h.bf16 %v1397_v10  ;;  %v1398_v13 = vunpack.i.l.bf16 %v1397_v10  ;;  %v1409_v15 = vunpack.i.h.bf16 %v1407_v11  ;;  %v1408_v16 = vunpack.i.l.bf16 %v1407_v11  ;;  %v835_v10 = vld [vmem:[#allocation7 + $0x10] sm:$0xff]  ;;  %v836_v11 = vld [vmem:[#allocation7 + $0x18] sm:$0xff] }
  0xd8   : > { %v363_v22 = vsel %vm362_vm1, %v1398_v13, %v1399_v12  ;;  %v542_v25 = vsel %vm541_vm2, %v1408_v16, %v1409_v15 }
  0xd9   : > { %v1402_v14 = vpop.permute.xlu0 %1401  ;;  %v1412_v17 = vpop.permute.xlu1 %1411 }
  0xda   : > { %v1404_v18 = vunpack.i.h.bf16 %v1402_v14  ;;  %v1403_v19 = vunpack.i.l.bf16 %v1402_v14  ;;  %v1414_v20 = vunpack.i.h.bf16 %v1412_v17  ;;  %v1413_v21 = vunpack.i.l.bf16 %v1412_v17 }
  0xdc   : > { %v364_v23 = vsel %vm362_vm1, %v1403_v19, %v1404_v18  ;;  %v543_v26 = vsel %vm541_vm2, %v1413_v21, %v1414_v20 }
  0xdd   : > { %v1278_v24 = vpack.c.bf16 %v364_v23, %v363_v22  ;;  %v1286_v28 = vpack.c.bf16 %v543_v26, %v542_v25 }
  0xdf   : > { %1279 = vmatprep.subr.bf16.mxu0 %v1278_v24 }
  0xe0   : > { %1281 = vmatpush3.bf16.msra.mxu0 %v1278_v24 }
  0xe1   : > { %1283 = vmatprep.subr.bf16.mxu0 %v1282_v6 }
  0xe3   : > { %1234 = vmatmul.mubr.msk.f32.vlgmr.msra.gmra.mrb[0].mxu0 %vm367_vm0, %v345_v27 }
  0xe4   : > { %1285 = vmatpush3.bf16.msra.mxu0 %v1282_v6  ;;  %1240 = vmatprep.mubr.msk.f32.mxu0 %vm367_vm0, %v1176_v29 }
  0xe5   : > { %1287 = vmatprep.subr.bf16.mxu0 %v1286_v28 }
  0xea   : > { %v639_v35 = vpop.permute.xlu1 %638  ;;  %v634_v36 = vpop.permute.xlu0 %633 }
  0xeb   : > { %1241 = vmatmul.mubr.msk.f32.vlgmr.msra.gmra.mrb[0].mxu0 %vm367_vm0, %v1177_v30 }
  0xec   : > { %1289 = vmatpush3.bf16.msra.mxu0 %v1286_v28  ;;  %1247 = vmatprep.mubr.msk.f32.mxu0 %vm367_vm0, %v1182_v31 }
  0xed   : > { %1303 = vmatprep.subr.bf16.mxu0 %v1282_v6 }
  0xf3   : > { %1248 = vmatmul.mubr.msk.f32.vlgmr.msra.gmra.mrb[0].mxu0 %vm367_vm0, %v1183_v32 }
  0xf4   : > { %1305 = vmatpush3.bf16.msra.mxu0 %v1282_v6  ;;  %1275 = vmatprep.mubr.msk.f32.mxu0 %vm367_vm0, %v948_v33 }
  0xf7   : > { %1276 = vmatmul.mubr.msk.f32.vlgmr.msra.gmra.mrb[2].mxu0 %vm367_vm0, %v949_v34 }
 0x1c6   : > { %v1249_v37 = vpop.f32.mrb[0].mxu0 }
 0x1c7   : > { %v642_v38 = vadd.f32 %v1249_v37, %v639_v35  ;;  %v618_v39 = vpop.f32.mrb[1].mxu0 }
 0x1c8   : > { %v641_v40 = vadd.f32 %v634_v36, %v618_v39 }
 0x1c9   : > { %v644_v42 = vmax.f32 %v642_v38, 0.0 }
 0x1ca   : > { %v643_v43 = vmax.f32 %v641_v40, 0.0  ;;  %v1277_v51 = vpop.f32.mrb[2].mxu0 }
 0x1cb   : > { %v1422_v44 = vpack.i.bf16 %v644_v42, %v1587_v3  ;;  %v1034_v52 = vpop.f32.mrb[3].mxu0 }
 0x1cc   : > { %v1417_v45 = vpack.i.bf16 %v643_v43, %v1587_v3  ;;  %v1294_v46 = vpack.c.bf16 %v644_v42, %v643_v43 }
 0x1cd   : > { %1423 = vrot.lane.b32.xlu0 %v1422_v44, %s1588_s11 }
 0x1ce   : > { %1418 = vrot.lane.b32.xlu1 %v1417_v45, %s1588_s11 }
 0x1d1   : > { %1433 = vrot.lane.b32.xlu0 %v1422_v44, %s1589_s18 }
 0x1d2   : > { %1428 = vrot.lane.b32.xlu1 %v1417_v45, %s1589_s18  ;;  %s328_s18 = scalar_lea.vmem [#allocation9], %s1173_s15  ;;  %s1055_s15 = scalar_lea.sflag [#allocation6], %s1792_s10 }
 0x1d3   : > { %s1069_s22 = sshll.u32 %s328_s18, 4  ;;  %s1885_s22 = int_to_ptr.vmem [resolvable:$true] %s1069_s22 }
 0x1d4   : > { %s1495_s9 = scalar_lea.vmem %s1885_s22, 256  ;;  %p1502_p12 = scmp.lt.s32.totalorder %s1885_s22, %s1500_s21 }
 0x1d5   : > { %941 = vperm.xlu0 %1415, %v933_v47   ;;  %p1496_p4 = scmp.ne.s32.totalorder %s1885_s22, %s1495_s9  ;;  %p1503_p11 = scmp.lt.s32.totalorder %s1501_s19, %s1495_s9 }
 0x1d6   : > { %936 = vperm.xlu1 %1416, %v932_v48  }
 0x1d7   : > { %p1497_p6 = pnand %p1496_p4, %p1733_p10  ;;  %p1504_p0 = por %p1503_p11, %p1502_p12 }
 0x1d9   : > { %959 = vperm.xlu0 %1415, %v951_v49   ;;  %p1498_p8 = pneg %p1497_p6 }
 0x1da   : > { %954 = vperm.xlu1 %1416, %v950_v50  }
 0x1db   : > { %p1505_p5 = pnand %p1504_p0, %p1498_p8 }
 0x23f   : > { %v1424_v53 = vpop.permute.xlu0 %1423 }
 0x240   : > { %v1426_v54 = vunpack.i.h.bf16 %v1424_v53  ;;  %v1425_v55 = vunpack.i.l.bf16 %v1424_v53  ;;  %v1419_v56 = vpop.permute.xlu1 %1418 }
 0x241   : > { %v1421_v57 = vunpack.i.h.bf16 %v1419_v56  ;;  %v1420_v58 = vunpack.i.l.bf16 %v1419_v56 }
 0x242   : > { %v669_v59 = vsel %vm362_vm1, %v1425_v55, %v1426_v54 }
 0x243   : > { %v1434_v60 = vpop.permute.xlu0 %1433  ;;  %v668_v61 = vsel %vm362_vm1, %v1420_v58, %v1421_v57 }
 0x244   : > { %v1436_v62 = vunpack.i.h.bf16 %v1434_v60  ;;  %v1435_v63 = vunpack.i.l.bf16 %v1434_v60  ;;  %v1429_v0 = vpop.permute.xlu1 %1428  ;;  %v1290_v1 = vpack.c.bf16 %v669_v59, %v668_v61 }
 0x245   : > { %v1431_v2 = vunpack.i.h.bf16 %v1429_v0  ;;  %v1430_v3 = vunpack.i.l.bf16 %v1429_v0 }
 0x246   : > { %1291 = vmatprep.subr.bf16.mxu1 %v1290_v1  ;;  %v846_v6 = vsel %vm541_vm2, %v1435_v63, %v1436_v62 }
 0x247   : > { %1293 = vmatpush3.bf16.msra.mxu1 %v1290_v1  ;;  %v845_v5 = vsel %vm541_vm2, %v1430_v3, %v1431_v2 }
 0x248   : > { %1295 = vmatprep.subr.bf16.mxu1 %v1294_v46  ;;  %v1298_v8 = vpack.c.bf16 %v846_v6, %v845_v5 }
 0x24a   : > { %1255 = vmatmul.mubr.msk.f32.vlgmr.msra.gmra.mrb[0].mxu1 %vm367_vm0, %v651_v4 }
 0x24b   : > { %1297 = vmatpush3.bf16.msra.mxu1 %v1294_v46  ;;  %1261 = vmatprep.mubr.msk.f32.mxu1 %vm367_vm0, %v648_v7 }
 0x24c   : > { %1299 = vmatprep.subr.bf16.mxu1 %v1298_v8 }
 0x252   : > { %1262 = vmatmul.mubr.msk.f32.vlgmr.msra.gmra.mrb[0].mxu1 %vm367_vm0, %v649_v9 }
 0x253   : > { %1301 = vmatpush3.bf16.msra.mxu1 %v1298_v8  ;;  %1268 = vmatprep.mubr.msk.f32.mxu1 %vm367_vm0, %v835_v10 }
 0x254   : > { %v942_v12 = vpop.permute.xlu0 %941 }
 0x255   : > { %v937_v13 = vpop.permute.xlu1 %936 }
 0x258   : > { %v960_v14 = vpop.permute.xlu0 %959 }
 0x259   : > { %v955_v16 = vpop.permute.xlu1 %954  ;;  %v1040_v20 = vadd.f32 %v1277_v51, %v960_v14 }
 0x25a   : > { %1269 = vmatmul.mubr.msk.f32.vlgmr.msra.gmra.mrb[0].mxu1 %vm367_vm0, %v836_v11  ;;  %v1035_v22 = vadd.f32 %v1034_v52, %v955_v16 }
 0x32d   : > { %v1270_v15 = vpop.f32.mrb[0].mxu1 }
 0x32e   : > { %v945_v17 = vadd.f32 %v1270_v15, %v942_v12  ;;  %v921_v18 = vpop.f32.mrb[1].mxu1 }
 0x32f   : > { %v944_v19 = vadd.f32 %v937_v13, %v921_v18 }
 0x330   : > { %v947_v21 = vmax.f32 %v945_v17, 0.0 }
 0x331   : > { %v946_v23 = vmax.f32 %v944_v19, 0.0 }
 0x332   : > { %v1044_v24 = vadd.f32 %v1040_v20, %v947_v21 }
 0x333   : > { %v1043_v25 = vadd.f32 %v1035_v22, %v946_v23 }
 0x334   : > { %v1046_v26 = vmax.f32 %v1044_v24, 0.0 }
 0x335   : > { %v1045_v27 = vmax.f32 %v1043_v25, 0.0 }
 0x336   : > { %1048 = vst [vmem:[%s328_s18 + $0x8] sm:$0xff] %v1046_v26 }
 0x337   : > { %1047 = vst [vmem:[%s328_s18] sm:$0xff] %v1045_v27 }
 0x338   : > { %1508 = shalt.err (!%p1505_p5)
}
 0x339   : > { %s1509_s20 = scalar_lea.hbm %s1890_s13, 256  ;;  %s1513_s18 = scalar_lea.hbm %s1946_s7, 512 }
 0x33a   : > { %p1510_p9 = scmp.ne.s32.totalorder %s1890_s13, %s1509_s20  ;;  %p1514_p3 = scmp.lt.u32.totalorder %s1890_s13, %s1946_s7 }
 0x33b   : > { %p1515_p7 = scmp.lt.u32.totalorder %s1513_s18, %s1509_s20  ;;  %p1517_p4 = scmp.lt.u32.totalorder %s1509_s20, %s1890_s13 }
 0x33c   : > { %p1511_p1 = pnand %p1510_p9, %p1733_p10 }
 0x33d   : > { %p1516_p13 = por %p1515_p7, %p1514_p3 }
 0x33e   : > { %p1512_p2 = pneg %p1511_p1 }
 0x33f   : > { %p1518_p6 = por %p1517_p4, %p1516_p13 }
 0x341   : > { %p1519_p8 = pnand %p1518_p6, %p1512_p2 }
 0x343   : > { %1522 = shalt.err (!%p1519_p8)
}
 0x344   : > { %s1592_s3 = smov 128   ;;  %s1593_s9 = smov 8  }
 0x345   : > { %1320 = dma.vmem_to_hbm [thread:$0]  (%p1733_p10), %s1885_s22, 256, %s1890_s13, %s1055_s15, %s1592_s3, %s1592_s3, %s1593_s9  }
 0x346 PF: > { %s1084_s27 = sand.u32 1, %s1561_s24   ;;  %p1970_p12 = scmp.ne.s32.totalorder %s1957_s12, 0 }
 0x347   : > { %p1971_p11 = scmp.ge.s32.totalorder %s1581_s29, 2  ;;  %s1085_s21 = scalar_lea.sflag [#allocation6], %s1084_s27 }
 0x349   : > { %p1331_p0 = pnand %p1971_p11, %p1970_p12 }
 0x34b   : > { %1556 = dma.done.wait (!%p1331_p0), %s1085_s21, 256  }
 0x34c   : > { %1558 = vsyncadd (!%p1331_p0), %s1085_s21, 4294967040  ;;  %s24_s29 = sadd.s32 1, %s1581_s29   ;;  %s1972_s24 = smov %s1565_s25 }
 0x34d   : > { %p21_p5 = scmp.ge.s32.totalorder %s24_s29, 4   ;;  %s1973_s25 = smov %s1569_s26 }
 0x34e   : > { %s1974_s26 = smov %s1742_s8  ;;  %s1975_s27 = smov %s1577_s28 }
 0x34f   : > { %s1976_s28 = smov %s1978_s17  ;;  %23 = sbr.rel (!%p21_p5) target bundleno = 9 (0x9), region = 105 }
 0x356   :  { %1090 = vsyncpa [#allocation5], 1 }
 0x357   :  { %1092 = vsyncpa [#allocation5 + $0x1], 1 }
 0x358   :  { %1093 = vsyncpa [#allocation8], 1 }
 0x359   :  { %1094 = vsyncpa [#allocation6], 1 }
 0x35a   :  { %1096 = vsyncpa [#allocation6 + $0x1], 1 }

</bundles_post_ra>
